<compile_context>
chip_gen: v5e
topology: v5e:2x2
jax: 0.10.0
libtpu: 0.0.40
codegen_flags: <defaults>
</compile_context>

<pallas_src>
import jax
import jax.numpy as jnp
from jax.experimental import pallas as pl
from jax.experimental.pallas import tpu as pltpu

# ----------------------------- problem sizes -----------------------------
IN_FEATURES = 4      # affine1 input
HIDDEN = 128         # affine1 output / affine2 input
OUT_FEATURES = 2     # affine2 output (softmax over this axis)

OUT_PAD = 8          # pad the tiny class axis to one sublane group for the MXU
TILE_B_MAX = 4096    # batch (lane) tile for large batches; trivially fits VMEM


def _policy_kernel(xT_ref, w1T_ref, b1_ref, w2d_ref, b2d_ref, o_ref):
    # xT_ref : (IN_FEATURES, tile_b) f32   -- batch on lanes
    # w1T_ref: (HIDDEN, IN_FEATURES) f32   -- grid-invariant, VMEM-resident
    # b1_ref : (HIDDEN, 1)           f32
    # w2d_ref: (OUT_PAD, HIDDEN)     f32   -- row k (<2): w2[:,k]-w2[:,1-k]; rest 0
    # b2d_ref: (OUT_FEATURES, 1)     f32   -- b2[k]-b2[1-k]
    # o_ref  : (OUT_FEATURES, tile_b) f32  -- lane-dense probability slab
    xT = xT_ref[...]

    # affine1 + ReLU (MXU matmul, f32 accumulate), batch on lanes
    hT = jnp.dot(w1T_ref[...], xT, preferred_element_type=jnp.float32)
    hT = jnp.maximum(hT + b1_ref[...], 0.0)                             # (HIDDEN, tile_b)

    # affine2 folded with the 2-class softmax:
    #   probs[k] = sigmoid(w2d[k] @ h + b2d[k])  ==  softmax(h@w2 + b2)[k]
    # Purely per-lane epilogue: no cross-lane reductions, 1 exp per element.
    dT = jnp.dot(w2d_ref[...], hT, preferred_element_type=jnp.float32)  # (OUT_PAD, tile_b)
    dT = dT[:OUT_FEATURES, :] + b2d_ref[...]                            # (2, tile_b)
    o_ref[...] = 1.0 / (1.0 + jnp.exp(-dT))


def prepare_policy_params(w1, b1, w2, b2):
    """One-time repack of the Policy parameters (outside the per-call hot path).

    Parameters are stored (in, out): w1 (4,128), b1 (128,), w2 (128,2), b2 (2,)
    so the reference forward is softmax(relu(x@w1 + b1) @ w2 + b2, axis=1).

    Returns kernel-ready tensors:
      w1T (HIDDEN, IN_FEATURES), b1c (HIDDEN, 1),
      w2d (OUT_PAD, HIDDEN) with row k = w2[:,k]-w2[:,1-k] (rows 2..7 zero),
      b2d (OUT_FEATURES, 1) with b2d[k] = b2[k]-b2[1-k],
    such that softmax(h@w2 + b2)[k] == sigmoid(w2d[k]@h + b2d[k]).
    """
    w1 = jnp.asarray(w1, jnp.float32)
    b1 = jnp.asarray(b1, jnp.float32)
    w2 = jnp.asarray(w2, jnp.float32)
    b2 = jnp.asarray(b2, jnp.float32)

    w1T = w1.T                                    # (HIDDEN, IN_FEATURES)
    b1c = b1.reshape(HIDDEN, 1)                   # (HIDDEN, 1)

    diff_w = jnp.stack([w2[:, 0] - w2[:, 1],
                        w2[:, 1] - w2[:, 0]], axis=0)          # (2, HIDDEN)
    w2d = jnp.zeros((OUT_PAD, HIDDEN), jnp.float32).at[:OUT_FEATURES, :].set(diff_w)
    b2d = jnp.stack([b2[0] - b2[1], b2[1] - b2[0]]).reshape(OUT_FEATURES, 1)
    return w1T, b1c, w2d, b2d


@jax.jit
def policy_forward(x, w1T, b1c, w2d, b2d):
    """x: (B, 4) f32, params from prepare_policy_params.
    Returns softmax(relu(x@w1 + b1) @ w2 + b2, axis=1), shape (B, 2)."""
    B = x.shape[0]
    xT = jnp.asarray(x, jnp.float32).T            # (4, B): tiny layout op, no pad pass

    if B <= TILE_B_MAX:
        tile_b = B                                # block == full array -> always legal
        n_tiles = 1
    else:
        tile_b = TILE_B_MAX                       # multiple of 128 -> lane-dense blocks
        n_tiles = pl.cdiv(B, tile_b)              # partial last block handled by masking
        # TODO(synk): for huge rollout batches on v7x, pick tile_b so n_tiles is even
        # to keep both TensorCores fed under dimension_semantics=("parallel",).

    probsT = pl.pallas_call(
        _policy_kernel,
        out_shape=jax.ShapeDtypeStruct((OUT_FEATURES, B), jnp.float32),
        grid=(n_tiles,),
        in_specs=[
            pl.BlockSpec((IN_FEATURES, tile_b), lambda i: (0, i)),
            pl.BlockSpec((HIDDEN, IN_FEATURES), lambda i: (0, 0)),   # resident
            pl.BlockSpec((HIDDEN, 1), lambda i: (0, 0)),             # resident
            pl.BlockSpec((OUT_PAD, HIDDEN), lambda i: (0, 0)),       # resident
            pl.BlockSpec((OUT_FEATURES, 1), lambda i: (0, 0)),       # resident
        ],
        out_specs=pl.BlockSpec((OUT_FEATURES, tile_b), lambda i: (0, i)),
        compiler_params=pltpu.CompilerParams(
            dimension_semantics=("parallel",)),   # v7x: shard grid steps across both TCs
    )(xT, w1T, b1c, w2d, b2d)

    return probsT.T                               # (B, 2): tiny final layout op


def _init_params(key):
    """Deterministic parameter init matching nn.Linear shapes, stored (in, out)."""
    k1, k2, k3, k4 = jax.random.split(key, 4)
    lim1 = 1.0 / jnp.sqrt(IN_FEATURES)
    lim2 = 1.0 / jnp.sqrt(HIDDEN)
    w1 = jax.random.uniform(k1, (IN_FEATURES, HIDDEN), jnp.float32, -lim1, lim1)
    b1 = jax.random.uniform(k2, (HIDDEN,), jnp.float32, -lim1, lim1)
    w2 = jax.random.uniform(k3, (HIDDEN, OUT_FEATURES), jnp.float32, -lim2, lim2)
    b2 = jax.random.uniform(k4, (OUT_FEATURES,), jnp.float32, -lim2, lim2)
    return w1, b1, w2, b2


def _reference(x, w1, b1, w2, b2):
    h = jnp.maximum(x @ w1 + b1, 0.0)
    return jax.nn.softmax(h @ w2 + b2, axis=1)


if __name__ == "__main__":
    key = jax.random.PRNGKey(0)
    key, xk, xk2 = jax.random.split(key, 3)

    w1, b1, w2, b2 = _init_params(key)
    params = prepare_policy_params(w1, b1, w2, b2)   # repacked once, reused

    # CartPole-style observation batch: (batch=2, obs_dim=4)
    x = jax.random.normal(xk, (2, IN_FEATURES), jnp.float32)
    probs = jax.block_until_ready(policy_forward(x, *params))
    ref = _reference(x, w1, b1, w2, b2)
    assert probs.shape == (2, OUT_FEATURES)
    assert jnp.allclose(probs, ref, atol=1e-5, rtol=1e-5)
    assert jnp.allclose(jnp.sum(probs, axis=1), 1.0, atol=1e-5)

    # secondary sanity at a non-aligned batch (exercises the non-128-multiple lane path)
    x2 = jax.random.normal(xk2, (300, IN_FEATURES), jnp.float32)
    probs2 = jax.block_until_ready(policy_forward(x2, *params))
    ref2 = _reference(x2, w1, b1, w2, b2)
    assert probs2.shape == (300, OUT_FEATURES)
    assert jnp.allclose(probs2, ref2, atol=1e-5, rtol=1e-5)

    print("KERNEL_OK")
</pallas_src>

<mosaic_0001>
module attributes {stable_mosaic.version = 11 : i64} {
  func.func @_policy_kernel(%arg0: i32, %arg1: memref<4x2xf32, #tpu.memory_space<vmem>>, %arg2: memref<128x4xf32, #tpu.memory_space<vmem>>, %arg3: memref<128x1xf32, #tpu.memory_space<vmem>>, %arg4: memref<8x128xf32, #tpu.memory_space<vmem>>, %arg5: memref<2x1xf32, #tpu.memory_space<vmem>>, %arg6: memref<2x2xf32, #tpu.memory_space<vmem>>) attributes {dimension_semantics = [#tpu.dimension_semantics<parallel>], iteration_bounds = array<i64: 1>, scalar_prefetch = 0 : i64, scratch_operands = 0 : i64, tpu.core_type = #tpu.core_type<tc>, window_params = [{transform_indices = @transform_0, window_bounds = array<i64: 4, 2>}, {pipeline_mode = #tpu.pipeline_mode<synchronous>, transform_indices = @transform_1, window_bounds = array<i64: 128, 4>}, {pipeline_mode = #tpu.pipeline_mode<synchronous>, transform_indices = @transform_2, window_bounds = array<i64: 128, 1>}, {pipeline_mode = #tpu.pipeline_mode<synchronous>, transform_indices = @transform_3, window_bounds = array<i64: 8, 128>}, {pipeline_mode = #tpu.pipeline_mode<synchronous>, transform_indices = @transform_4, window_bounds = array<i64: 2, 1>}, {transform_indices = @transform_5, window_bounds = array<i64: 2, 2>}]} {
    %c0 = arith.constant 0 : index
    %c0_0 = arith.constant 0 : index
    %0 = vector.load %arg1[%c0, %c0_0] : memref<4x2xf32, #tpu.memory_space<vmem>>, vector<4x2xf32>
    %c0_1 = arith.constant 0 : index
    %c0_2 = arith.constant 0 : index
    %1 = vector.load %arg2[%c0_1, %c0_2] : memref<128x4xf32, #tpu.memory_space<vmem>>, vector<128x4xf32>
    %cst = arith.constant dense<0.000000e+00> : vector<128x2xf32>
    %2 = tpu.matmul %1, %0, %cst {dimension_numbers = #tpu.dot_dimension_numbers<[1], [0], [0], [1], [0, 0, 1, 1], [], []>} : vector<128x4xf32>, vector<4x2xf32>, vector<128x2xf32> -> vector<128x2xf32>
    %c0_3 = arith.constant 0 : index
    %c0_4 = arith.constant 0 : index
    %3 = vector.load %arg3[%c0_3, %c0_4] : memref<128x1xf32, #tpu.memory_space<vmem>>, vector<128x1xf32>
    %4 = vector.broadcast %3 : vector<128x1xf32> to vector<128x2xf32>
    %5 = arith.addf %2, %4 : vector<128x2xf32>
    %cst_5 = arith.constant 0.000000e+00 : f32
    %6 = vector.broadcast %cst_5 : f32 to vector<128x2xf32>
    %7 = arith.maximumf %5, %6 : vector<128x2xf32>
    %c0_6 = arith.constant 0 : index
    %c0_7 = arith.constant 0 : index
    %8 = vector.load %arg4[%c0_6, %c0_7] : memref<8x128xf32, #tpu.memory_space<vmem>>, vector<8x128xf32>
    %cst_8 = arith.constant dense<0.000000e+00> : vector<8x2xf32>
    %9 = tpu.matmul %8, %7, %cst_8 {dimension_numbers = #tpu.dot_dimension_numbers<[1], [0], [0], [1], [0, 0, 1, 1], [], []>} : vector<8x128xf32>, vector<128x2xf32>, vector<8x2xf32> -> vector<8x2xf32>
    %10 = vector.extract_strided_slice %9 {offsets = [0, 0], sizes = [2, 2], strides = [1, 1]} : vector<8x2xf32> to vector<2x2xf32>
    %c0_9 = arith.constant 0 : index
    %c0_10 = arith.constant 0 : index
    %11 = vector.load %arg5[%c0_9, %c0_10] : memref<2x1xf32, #tpu.memory_space<vmem>>, vector<2x1xf32>
    %12 = vector.broadcast %11 : vector<2x1xf32> to vector<2x2xf32>
    %13 = arith.addf %10, %12 : vector<2x2xf32>
    %cst_11 = arith.constant 0.000000e+00 : f32
    %14 = vector.broadcast %cst_11 : f32 to vector<2x2xf32>
    %15 = arith.subf %14, %13 : vector<2x2xf32>
    %16 = math.exp %15 : vector<2x2xf32>
    %cst_12 = arith.constant 1.000000e+00 : f32
    %17 = vector.broadcast %cst_12 : f32 to vector<2x2xf32>
    %18 = arith.addf %17, %16 : vector<2x2xf32>
    %cst_13 = arith.constant 1.000000e+00 : f32
    %19 = vector.broadcast %cst_13 : f32 to vector<2x2xf32>
    %20 = arith.divf %19, %18 : vector<2x2xf32>
    %c0_14 = arith.constant 0 : index
    %c0_15 = arith.constant 0 : index
    %21 = vector.load %arg6[%c0_14, %c0_15] : memref<2x2xf32, #tpu.memory_space<vmem>>, vector<2x2xf32>
    tpu.vector_store %arg6[%c0_14, %c0_15], %20 {strides = array<i32>} : memref<2x2xf32, #tpu.memory_space<vmem>>, vector<2x2xf32>,
    return
  }
  func.func @transform_0(%arg0: i32) -> (i32, i32) {
    %c0_i32 = arith.constant 0 : i32
    %c0_i32_0 = arith.constant 0 : i32
    return %c0_i32, %arg0 : i32, i32
  }
  func.func @transform_1(%arg0: i32) -> (i32, i32) {
    %c0_i32 = arith.constant 0 : i32
    %c0_i32_0 = arith.constant 0 : i32
    %c0_i32_1 = arith.constant 0 : i32
    return %c0_i32, %c0_i32_0 : i32, i32
  }
  func.func @transform_2(%arg0: i32) -> (i32, i32) {
    %c0_i32 = arith.constant 0 : i32
    %c0_i32_0 = arith.constant 0 : i32
    %c0_i32_1 = arith.constant 0 : i32
    return %c0_i32, %c0_i32_0 : i32, i32
  }
  func.func @transform_3(%arg0: i32) -> (i32, i32) {
    %c0_i32 = arith.constant 0 : i32
    %c0_i32_0 = arith.constant 0 : i32
    %c0_i32_1 = arith.constant 0 : i32
    return %c0_i32, %c0_i32_0 : i32, i32
  }
  func.func @transform_4(%arg0: i32) -> (i32, i32) {
    %c0_i32 = arith.constant 0 : i32
    %c0_i32_0 = arith.constant 0 : i32
    %c0_i32_1 = arith.constant 0 : i32
    return %c0_i32, %c0_i32_0 : i32, i32
  }
  func.func @transform_5(%arg0: i32) -> (i32, i32) {
    %c0_i32 = arith.constant 0 : i32
    %c0_i32_0 = arith.constant 0 : i32
    return %c0_i32, %arg0 : i32, i32
  }
}

</mosaic_0001>

<bundles_post_ra>
// kernel: policy_forward.1
= control target key start
LH: loop header
LB: loop body
LE: loop exit
PB: predicated region body
PF: predicated region fallthrough
CT: control target
= control target key end

     0   :  { %vm182_vm0 = vcmask 1043456   ;;  %v347_v0 = vmov 0   ;;  %vm133_vm1 = vcmask 31744   ;;  %vm314_vm5 = vcmask 9216   ;;  %s508_s2 = inlined_call_operand.vmem [shape: f32[128,1], index: 2, kind: input, shape index: {}]   ;;  %s509_s0 = inlined_call_operand.vmem [shape: f32[4,2], index: 0, kind: input, shape index: {}]   ;;  %s510_s1 = inlined_call_operand.vmem [shape: f32[128,4], index: 1, kind: input, shape index: {}]   ;;  %s511_s4 = inlined_call_operand.vmem [shape: f32[2,1], index: 4, kind: input, shape index: {}]   ;;  %s512_s3 = inlined_call_operand.vmem [shape: f32[8,128], index: 3, kind: input, shape index: {}]   ;;  %s513_s5 = inlined_call_operand.vmem [shape: f32[2,2], index: 5, kind: output, shape index: {}]  }
   0x1   :  { %340 = vset.pattern.permute.xlu0 %v347_v0  ;;  %v52_v1 = vld [vmem:[%s508_s2 + $0x78] sm:$0xff]  ;;  %v20_v2 = vld [vmem:[%s509_s0] sm:$0xf]  ;;  %341 = vset.pattern.permute.xlu1 %v347_v0  ;;  %v27_v4 = vld [vmem:[%s510_s1 + $0x30] sm:$0xff] }
   0x2   :  { %v21_v3 = vld [vmem:[%s510_s1] sm:$0xff]  ;;  %130 = vperm.xlu0 %340, %v52_v1   ;;  %320 = vmatpush.msk.msra.mxu0 %vm182_vm0, %v20_v2  ;;  %v50_v6 = vld [vmem:[%s508_s2 + $0x68] sm:$0xff]  ;;  %v51_v7 = vld [vmem:[%s508_s2 + $0x70] sm:$0xff] }
   0x3   :  { %v33_v5 = vld [vmem:[%s510_s1 + $0x60] sm:$0xff]  ;;  %337 = vmatpush.msk.msra.mxu2 %vm182_vm0, %v20_v2  ;;  %338 = vmatpush.msk.msra.mxu3 %vm182_vm0, %v20_v2  ;;  %v48_v8 = vld [vmem:[%s508_s2 + $0x58] sm:$0xff]  ;;  %v22_v9 = vld [vmem:[%s510_s1 + $0x8] sm:$0xff] }
   0x4   :  { %321 = vmatmul.msk.f32.vlgmr.msra.gmra.mxu0 %vm133_vm1, %v21_v3  ;;  %327 = vmatmul.msk.f32.vlgmr.msra.gmra.mxu2 %vm133_vm1, %v27_v4  ;;  %v28_v10 = vld [vmem:[%s510_s1 + $0x38] sm:$0xff]  ;;  %v34_v11 = vld [vmem:[%s510_s1 + $0x68] sm:$0xff]  ;;  %v49_v12 = vld [vmem:[%s508_s2 + $0x60] sm:$0xff] }
   0x5   :  { %333 = vmatmul.msk.f32.vlgmr.msra.gmra.mxu3 %vm133_vm1, %v33_v5  ;;  %120 = vperm.xlu1 %341, %v50_v6   ;;  %v47_v13 = vld [vmem:[%s508_s2 + $0x50] sm:$0xff]  ;;  %v46_v14 = vld [vmem:[%s508_s2 + $0x48] sm:$0xff]  ;;  %v29_v16 = vld [vmem:[%s510_s1 + $0x40] sm:$0xff] }
   0x6   :  { %342 = vset.pattern.permute.xlu2 %v347_v0  ;;  %v23_v15 = vld [vmem:[%s510_s1 + $0x10] sm:$0xff]  ;;  %v45_v18 = vld [vmem:[%s508_s2 + $0x40] sm:$0xff]  ;;  %v44_v19 = vld [vmem:[%s508_s2 + $0x38] sm:$0xff] }
   0x7   :  { %110 = vperm.xlu2 %342, %v48_v8   ;;  %v35_v17 = vld [vmem:[%s510_s1 + $0x70] sm:$0xff]  ;;  %v24_v21 = vld [vmem:[%s510_s1 + $0x18] sm:$0xff]  ;;  %v30_v22 = vld [vmem:[%s510_s1 + $0x48] sm:$0xff] }
   0x8   :  { %v43_v20 = vld [vmem:[%s508_s2 + $0x30] sm:$0xff]  ;;  %v36_v23 = vld [vmem:[%s510_s1 + $0x78] sm:$0xff]  ;;  %v42_v24 = vld [vmem:[%s508_s2 + $0x28] sm:$0xff] }
   0x9   :  { %v41_v25 = vld [vmem:[%s508_s2 + $0x20] sm:$0xff]  ;;  %v40_v26 = vld [vmem:[%s508_s2 + $0x18] sm:$0xff]  ;;  %v31_v28 = vld [vmem:[%s510_s1 + $0x50] sm:$0xff] }
   0xa   :  { %125 = vperm.xlu0 %340, %v51_v7   ;;  %v25_v27 = vld [vmem:[%s510_s1 + $0x20] sm:$0xff]  ;;  %v39_v29 = vld [vmem:[%s508_s2 + $0x10] sm:$0xff]  ;;  %v38_v30 = vld [vmem:[%s508_s2 + $0x8] sm:$0xff] }
   0xb   :  { %v37_v31 = vld [vmem:[%s508_s2] sm:$0xff]  ;;  %v26_v32 = vld [vmem:[%s510_s1 + $0x28] sm:$0xff]  ;;  %v32_v33 = vld [vmem:[%s510_s1 + $0x58] sm:$0xff] }
   0xc   :  { %322 = vmatmul.msk.f32.gmra.mxu0 %vm133_vm1, %v22_v9  ;;  %328 = vmatmul.msk.f32.gmra.mxu2 %vm133_vm1, %v28_v10  ;;  %v288_v34 = vld [vmem:[%s511_s4] sm:$0x3] }
   0xd   :  { %334 = vmatmul.msk.f32.gmra.mxu3 %vm133_vm1, %v34_v11  ;;  %115 = vperm.xlu1 %341, %v49_v12  }
   0xf   :  { %105 = vperm.xlu2 %342, %v47_v13  }
  0x12   :  { %100 = vperm.xlu0 %340, %v46_v14  }
  0x14   :  { %323 = vmatmul.msk.f32.gmra.mxu0 %vm133_vm1, %v23_v15  ;;  %329 = vmatmul.msk.f32.gmra.mxu2 %vm133_vm1, %v29_v16 }
  0x15   :  { %335 = vmatmul.msk.f32.gmra.mxu3 %vm133_vm1, %v35_v17  ;;  %95 = vperm.xlu1 %341, %v45_v18  }
  0x17   :  { %90 = vperm.xlu2 %342, %v44_v19  }
  0x1a   :  { %85 = vperm.xlu0 %340, %v43_v20  }
  0x1c   :  { %324 = vmatmul.msk.f32.gmra.mxu0 %vm133_vm1, %v24_v21  ;;  %330 = vmatmul.msk.f32.gmra.mxu2 %vm133_vm1, %v30_v22 }
  0x1d   :  { %336 = vmatmul.msk.f32.gmra.mxu3 %vm133_vm1, %v36_v23  ;;  %80 = vperm.xlu1 %341, %v42_v24  }
  0x1f   :  { %75 = vperm.xlu2 %342, %v41_v25  }
  0x22   :  { %70 = vperm.xlu0 %340, %v40_v26  }
  0x24   :  { %325 = vmatmul.msk.f32.gmra.mxu0 %vm133_vm1, %v25_v27  ;;  %331 = vmatmul.msk.f32.gmra.mxu2 %vm133_vm1, %v31_v28 }
  0x25   :  { %65 = vperm.xlu1 %341, %v39_v29  }
  0x27   :  { %60 = vperm.xlu2 %342, %v38_v30  }
  0x2a   :  { %55 = vperm.xlu0 %340, %v37_v31  }
  0x2c   :  { %326 = vmatmul.msk.f32.gmra.mxu0 %vm133_vm1, %v26_v32  ;;  %332 = vmatmul.msk.f32.gmra.mxu2 %vm133_vm1, %v32_v33 }
  0x2d   :  { %291 = vperm.xlu1 %341, %v288_v34  }
  0x61   :  { %v111_v42 = vpop.permute.xlu2 %110 }
  0x69   :  { %v106_v51 = vpop.permute.xlu2 %105 }
  0x71   :  { %v91_v0 = vpop.permute.xlu2 %90 }
  0x74   :  { %v131_v38 = vpop.permute.xlu0 %130 }
  0x77   :  { %v121_v43 = vpop.permute.xlu1 %120 }
  0x79   :  { %v76_v11 = vpop.permute.xlu2 %75 }
  0x7c   :  { %v126_v46 = vpop.permute.xlu0 %125 }
  0x7f   :  { %v116_v50 = vpop.permute.xlu1 %115 }
  0x81   :  { %v496_v35 = vpop.f32.mrf.mxu0  ;;  %v61_v25 = vpop.permute.xlu2 %60 }
  0x84   :  { %v101_v54 = vpop.permute.xlu0 %100 }
  0x87   :  { %v221_v36 = vpop.f32.mrf.mxu2  ;;  %v96_v63 = vpop.permute.xlu1 %95 }
  0x88   :  { %v239_v37 = vpop.f32.mrf.mxu3 }
  0x89   :  { %v498_v39 = vpop.f32.mrf.mxu0  ;;  %v240_v58 = vadd.f32 %v239_v37, %v116_v50 }
  0x8a   :  { %v207_v30 = vadd.f32 %v498_v39, %v61_v25 }
  0x8b   :  { %v263_v62 = vmax.f32 %v240_v58, 0.0 }
  0x8c   :  { %v86_v1 = vpop.permute.xlu0 %85  ;;  %v252_v33 = vmax.f32 %v207_v30, 0.0 }
  0x8d   :  { %v222_v16 = vadd.f32 %v221_v36, %v86_v1  ;;  %v267_v36 = vld [vmem:[%s512_s3] sm:$0xff] }
  0x8f   :  { %v224_v40 = vpop.f32.mrf.mxu2  ;;  %v81_v10 = vpop.permute.xlu1 %80  ;;  %v257_v20 = vmax.f32 %v222_v16, 0.0 }
  0x90   :  { %v242_v41 = vpop.f32.mrf.mxu3  ;;  %v225_v12 = vadd.f32 %v224_v40, %v91_v0 }
  0x91   :  { %v209_v47 = vpop.f32.mrf.mxu0  ;;  %v243_v55 = vadd.f32 %v242_v41, %v121_v43 }
  0x92   :  { %v258_v18 = vmax.f32 %v225_v12, 0.0 }
  0x93   :  { %v264_v60 = vmax.f32 %v243_v55, 0.0 }
  0x94   :  { %v71_v14 = vpop.permute.xlu0 %70 }
  0x97   :  { %v227_v44 = vpop.f32.mrf.mxu2  ;;  %v66_v24 = vpop.permute.xlu1 %65 }
  0x98   :  { %v245_v45 = vpop.f32.mrf.mxu3  ;;  %v228_v8 = vadd.f32 %v227_v44, %v96_v63  ;;  %v210_v26 = vadd.f32 %v209_v47, %v66_v24 }
  0x99   :  { %v246_v52 = vadd.f32 %v245_v45, %v126_v46  ;;  %v212_v56 = vpop.f32.mrf.mxu0 }
  0x9a   :  { %v259_v17 = vmax.f32 %v228_v8, 0.0  ;;  %v213_v22 = vadd.f32 %v212_v56, %v71_v14  ;;  %v253_v31 = vmax.f32 %v210_v26, 0.0 }
  0x9b   :  { %v265_v59 = vmax.f32 %v246_v52, 0.0 }
  0x9c   :  { %v56_v28 = vpop.permute.xlu0 %55  ;;  %v254_v29 = vmax.f32 %v213_v22, 0.0 }
  0x9d   :  { %v204_v32 = vadd.f32 %v496_v35, %v56_v28 }
  0x9f   :  { %v230_v48 = vpop.f32.mrf.mxu2  ;;  %v251_v34 = vmax.f32 %v204_v32, 0.0  ;;  %v292_v37 = vpop.permute.xlu1 %291 }
  0xa0   :  { %v248_v49 = vpop.f32.mrf.mxu3  ;;  %v231_v6 = vadd.f32 %v230_v48, %v101_v54 }
  0xa1   :  { %v249_v53 = vadd.f32 %v248_v49, %v131_v38  ;;  %v215_v2 = vpop.f32.mrf.mxu0 }
  0xa2   :  { %v260_v13 = vmax.f32 %v231_v6, 0.0  ;;  %v216_v21 = vadd.f32 %v215_v2, %v76_v11 }
  0xa3   :  { %v266_v57 = vmax.f32 %v249_v53, 0.0 }
  0xa4   :  { %v255_v27 = vmax.f32 %v216_v21, 0.0 }
  0xa5   :  { %268 = vmatpush.msra.mxu1 %v266_v57 }
  0xa7   :  { %269 = vmatpush.msra.mxu1 %v265_v59  ;;  %v233_v61 = vpop.f32.mrf.mxu2 }
  0xa8   :  { %v234_v4 = vadd.f32 %v233_v61, %v106_v51 }
  0xa9   :  { %270 = vmatpush.msra.mxu1 %v264_v60  ;;  %v218_v15 = vpop.f32.mrf.mxu0 }
  0xaa   :  { %v261_v9 = vmax.f32 %v234_v4, 0.0  ;;  %v219_v19 = vadd.f32 %v218_v15, %v81_v10 }
  0xab   :  { %271 = vmatpush.msra.mxu1 %v263_v62 }
  0xac   :  { %v256_v23 = vmax.f32 %v219_v19, 0.0 }
  0xaf   :  { %v236_v3 = vpop.f32.mrf.mxu2 }
  0xb0   :  { %v237_v5 = vadd.f32 %v236_v3, %v111_v42 }
  0xb2   :  { %v262_v7 = vmax.f32 %v237_v5, 0.0 }
  0xb4   :  { %272 = vmatpush.msra.mxu1 %v262_v7 }
  0xb6   :  { %273 = vmatpush.msra.mxu1 %v261_v9 }
  0xb8   :  { %274 = vmatpush.msra.mxu1 %v260_v13 }
  0xba   :  { %275 = vmatpush.msra.mxu1 %v259_v17 }
  0xbc   :  { %276 = vmatpush.msra.mxu1 %v258_v18 }
  0xbe   :  { %277 = vmatpush.msra.mxu1 %v257_v20 }
  0xc0   :  { %278 = vmatpush.msra.mxu1 %v256_v23 }
  0xc2   :  { %279 = vmatpush.msra.mxu1 %v255_v27 }
  0xc4   :  { %280 = vmatpush.msra.mxu1 %v254_v29 }
  0xc6   :  { %281 = vmatpush.msra.mxu1 %v253_v31 }
  0xc8   :  { %282 = vmatpush.msra.mxu1 %v252_v33 }
  0xca   :  { %283 = vmatpush.msra.mxu1 %v251_v34 }
  0xcb   :  { %284 = vmatmul.f32.vlgmr.msra.gmra.mxu1 %v267_v36 }
 0x148   :  { %v285_v38 = vpop.f32.mrf.mxu1 }
 0x149   :  { %v294_v40 = vadd.f32 %v292_v37, %v285_v38 }
 0x14b   :  { %v295_v41 = vsub.f32 0.0, %v294_v40 }
 0x14d   :  { %v296_v39 = vmul.f32 1.442695, %v295_v41 }
 0x14f   :  { %343 = vpow2.f32 %v296_v39 }
 0x155   :  { %v344_v42 = vpop.eup %343 }
 0x156   :  { %v298_v43 = vadd.f32 1.0, %v344_v42 }
 0x158   :  { %345 = vrcp.f32 %v298_v43  ;;  %v310_v46 = vand.u32 2147483648, %v298_v43  ;;  %v308_v48 = vand.u32 2147483647, %v298_v43  ;;  %vm304_vm3 = vweird.f32 %v298_v43 }
 0x15a   :  { %v311_v50 = vor.u32 1.1754944e-38, %v310_v46  ;;  %vm309_vm6 = vcmp.eq.f32.partialorder %v308_v48, 8.507059e+37 }
 0x15e   :  { %v346_v35 = vpop.eup %345 }
 0x15f   :  { %v300_v44 = vmul.f32 %v346_v35, %v298_v43  ;;  %vm305_vm2 = vweird.f32 %v346_v35 }
 0x160   :  { %vm306_vm4 = vmor %vm304_vm3, %vm305_vm2 }
 0x161   :  { %v301_v45 = vsub.f32 1.0, %v300_v44 }
 0x163   :  { %v302_v47 = vmul.f32 %v346_v35, %v301_v45 }
 0x165   :  { %v303_v49 = vadd.f32 %v346_v35, %v302_v47 }
 0x167   :  { %v307_v51 = vsel %vm306_vm4, %v346_v35, %v303_v49 }
 0x168   :  { %v312_v52 = vsel %vm309_vm6, %v311_v50, %v307_v51 }
 0x169   :  { %315 = vst.msk [vmem:[%s513_s5] sm:$0x3] %vm314_vm5, %v312_v52 }

</bundles_post_ra>
